<compile_context>
chip_gen: v7x
topology: tpu7x:2x2x1
jax: 0.10.0
libtpu: 0.0.40
codegen_flags: <defaults>
</compile_context>

<pallas_src>
import functools

import jax
import jax.numpy as jnp
import numpy as np
from jax import lax
from jax.experimental import pallas as pl
from jax.experimental.pallas import tpu as pltpu

_TAPS = tuple((ky, kx) for ky in (-1, 0, 1) for kx in (-1, 0, 1))
_HALO = 128  # lane-aligned halo on each side of the flattened spatial axis; needs W+1 <= _HALO


# ------------------------------ Pallas kernel ------------------------------

def _im2col_3x3(src, pad_ref, col_ref, H, W):
    """src: (C, H*W) f32 value.  Fills col_ref[:9*C] (bf16): row-block t holds src
    shifted by tap t (zero outside the image), so a 3x3 conv becomes one matmul.
    Assumes the two _HALO-wide halo regions of pad_ref are already zero."""
    C, HW = src.shape
    pad_ref[:C, _HALO:_HALO + HW] = src                      # middle fully overwritten
    lane = lax.broadcasted_iota(jnp.int32, (1, HW), 1)
    xx = lane % W
    # Vertical out-of-image reads already land in the zero halo; only horizontal wrap
    # (kx = +-1) needs masking.  Masks hoisted out of the tap loop.
    mask_l = xx >= 1          # valid lanes for kx = -1
    mask_r = xx < (W - 1)     # valid lanes for kx = +1
    for t, (ky, kx) in enumerate(_TAPS):
        off = ky * W + kx
        shifted = pad_ref[:C, _HALO + off:_HALO + off + HW]  # static lane shift
        if kx == -1:
            shifted = jnp.where(mask_l, shifted, 0.0)
        elif kx == 1:
            shifted = jnp.where(mask_r, shifted, 0.0)
        col_ref[t * C:(t + 1) * C, :] = shifted.astype(col_ref.dtype)


def _conv_bn_silu(col, w, b):
    # (Cout, 9*Cin) bf16 @ (9*Cin, HW) bf16 -> f32 accumulate; single MXU pass.
    y = jnp.dot(w, col, preferred_element_type=jnp.float32) + b
    # SiLU epilogue in f32; approximate EUP reciprocal keeps it off the VPU.
    return y * pl.reciprocal(1.0 + jnp.exp(-y), approx=True)


def _bottleneck_kernel(x_ref, w1_ref, b1_ref, w2_ref, b2_ref, o_ref,
                       pad_ref, col_ref, *, H, W, C1, Cm, add):
    HW = H * W
    # Re-zero ONLY the two 128-lane halos each step (cheap, and correct regardless of
    # how the "parallel" batch axis is split across TensorCores).
    pad_ref[:, :_HALO] = jnp.zeros((pad_ref.shape[0], _HALO), pad_ref.dtype)
    pad_ref[:, _HALO + HW:] = jnp.zeros((pad_ref.shape[0], _HALO), pad_ref.dtype)

    x = x_ref[0].astype(jnp.float32)                              # (C1, HW)
    _im2col_3x3(x, pad_ref, col_ref, H, W)
    y1 = _conv_bn_silu(col_ref[:9 * C1, :], w1_ref[...], b1_ref[...])   # (Cm, HW) f32
    _im2col_3x3(y1, pad_ref, col_ref, H, W)                       # scratch reused
    y2 = _conv_bn_silu(col_ref[:9 * Cm, :], w2_ref[...], b2_ref[...])   # (C2, HW) f32
    if add:
        y2 = y2 + x
    o_ref[0] = y2.astype(o_ref.dtype)


# ------------------------------ host wrapper -------------------------------

def bottleneck_forward(x_nchw, params):
    """Bottleneck forward.  Input/output NCHW (PyTorch convention)."""
    N, C1, H, W = x_nchw.shape
    HW = H * W
    assert W + 1 <= _HALO, "image width too large for the fixed lane halo"
    w1, b1, w2, b2 = params["w1"], params["b1"], params["w2"], params["b2"]
    Cm = w1.shape[0]                     # hidden channels c_
    C2 = w2.shape[0]
    add = bool(params["add"]) and (C1 == C2)

    # Pad hidden channels up to a sublane multiple (e=0.5 often gives Cm % 8 != 0).
    # Zero conv1 rows stay zero through SiLU and meet zero conv2 input columns, so
    # results are unchanged; removes masked sublane stores and a tiny MXU M-dim.
    Cm_pad = max(8, -(-Cm // 8) * 8)
    if Cm_pad != Cm:
        w1 = jnp.pad(w1, ((0, Cm_pad - Cm), (0, 0), (0, 0), (0, 0)))
        b1 = jnp.pad(b1, ((0, Cm_pad - Cm),))
        w2 = jnp.pad(w2, ((0, 0), (0, Cm_pad - Cm), (0, 0), (0, 0)))
    Cm = Cm_pad

    # OIHW folded weights -> (Cout, 9*Cin), tap-major columns matching im2col rows.
    # bf16 weights: the MXU runs a single bf16 pass at default precision anyway.
    w1_2d = jnp.transpose(w1, (0, 2, 3, 1)).reshape(Cm, 9 * C1).astype(jnp.bfloat16)
    w2_2d = jnp.transpose(w2, (0, 2, 3, 1)).reshape(C2, 9 * Cm).astype(jnp.bfloat16)
    b1_2d = b1.reshape(Cm, 1).astype(jnp.float32)
    b2_2d = b2.reshape(C2, 1).astype(jnp.float32)

    x3 = x_nchw.reshape(N, C1, HW)       # channels on sublane, spatial on lane

    # Shared (between the two convs) scratch: f32 halo buffer + bf16 im2col buffer.
    Cmax = max(C1, Cm)
    itemsize = np.dtype(x_nchw.dtype).itemsize
    scratch_bytes = Cmax * (HW + 2 * _HALO) * 4 + 9 * Cmax * HW * 2
    io_bytes = 2 * (C1 + C2) * HW * itemsize                 # double-buffered in/out
    w_bytes = 2 * (w1_2d.size + w2_2d.size) * 2 + (Cm + C2) * 4
    vmem_limit = int(min(max(2 * (scratch_bytes + io_bytes + w_bytes), 8 << 20),
                         64 << 20))

    kernel = functools.partial(_bottleneck_kernel, H=H, W=W, C1=C1, Cm=Cm, add=add)
    out = pl.pallas_call(
        kernel,
        out_shape=jax.ShapeDtypeStruct((N, C2, HW), x_nchw.dtype),
        grid=(N,),
        in_specs=[
            pl.BlockSpec((1, C1, HW), lambda n: (n, 0, 0)),
            pl.BlockSpec((Cm, 9 * C1), lambda n: (0, 0)),
            pl.BlockSpec((Cm, 1), lambda n: (0, 0)),
            pl.BlockSpec((C2, 9 * Cm), lambda n: (0, 0)),
            pl.BlockSpec((C2, 1), lambda n: (0, 0)),
        ],
        out_specs=pl.BlockSpec((1, C2, HW), lambda n: (n, 0, 0)),
        scratch_shapes=[
            pltpu.VMEM((Cmax, HW + 2 * _HALO), jnp.float32),   # shared zero-halo buffer
            pltpu.VMEM((9 * Cmax, HW), jnp.bfloat16),          # shared im2col buffer
        ],
        compiler_params=pltpu.CompilerParams(
            dimension_semantics=("parallel",),
            vmem_limit_bytes=vmem_limit),
    )(x3, w1_2d, b1_2d, w2_2d, b2_2d)
    return out.reshape(N, C2, H, W)


# ------------------------- parameter construction --------------------------

def _init_folded_conv(key, cin, cout, k=3, eps=1e-3):
    """Deterministic Conv2d(bias=False)+BN params, BN folded into (w_OIHW, b)."""
    k1, k2, k3, k4, k5 = jax.random.split(key, 5)
    w = jax.random.normal(k1, (cout, cin, k, k), jnp.float32) / np.sqrt(cin * k * k)
    gamma = 1.0 + 0.1 * jax.random.normal(k2, (cout,), jnp.float32)
    beta = 0.1 * jax.random.normal(k3, (cout,), jnp.float32)
    mean = 0.1 * jax.random.normal(k4, (cout,), jnp.float32)
    var = 1.0 + 0.5 * jax.random.uniform(k5, (cout,), jnp.float32)
    scale = gamma / jnp.sqrt(var + eps)
    return w * scale[:, None, None, None], beta - mean * scale


def init_bottleneck_params(key, c1, c2, shortcut=True, e=0.5):
    c_ = int(c2 * e)
    k1, k2 = jax.random.split(key)
    w1, b1 = _init_folded_conv(k1, c1, c_, 3)
    w2, b2 = _init_folded_conv(k2, c_, c2, 3)
    return dict(w1=w1, b1=b1, w2=w2, b2=b2, add=(shortcut and c1 == c2))


# --------------------------- pure-JAX reference -----------------------------

def _ref_conv_bn_silu(x_nhwc, w_oihw, b):
    w_hwio = jnp.transpose(w_oihw, (2, 3, 1, 0))
    y = lax.conv_general_dilated(
        x_nhwc, w_hwio, (1, 1), [(1, 1), (1, 1)],
        dimension_numbers=("NHWC", "HWIO", "NHWC"),
        precision=lax.Precision.HIGHEST) + b
    return y * jax.nn.sigmoid(y)


def bottleneck_reference(x_nchw, params):
    x = jnp.transpose(x_nchw, (0, 2, 3, 1))
    y = _ref_conv_bn_silu(x, params["w1"], params["b1"])
    y = _ref_conv_bn_silu(y, params["w2"], params["b2"])
    if params["add"]:
        y = y + x
    return jnp.transpose(y, (0, 3, 1, 2))


# ----------------------------------- main -----------------------------------

if __name__ == "__main__":
    key = jax.random.PRNGKey(0)
    kx, kp = jax.random.split(key)

    # Bottleneck(c1=8, c2=8, shortcut=True, g=1, k=(3,3), e=0.5) -> c_ = 4 (padded to 8)
    N, C1, C2, H, W = 2, 8, 8, 16, 16
    x = jax.random.normal(kx, (N, C1, H, W), jnp.float32)     # NCHW
    params = init_bottleneck_params(kp, C1, C2, shortcut=True, e=0.5)

    out = jax.block_until_ready(bottleneck_forward(x, params))
    ref = jax.block_until_ready(bottleneck_reference(x, params))

    assert out.shape == (N, C2, H, W), out.shape
    # Accuracy contract: bf16-level matmul inputs (single bf16 MXU pass, f32 accumulate)
    # and approximate-reciprocal sigmoid across two conv layers, vs an f32 HIGHEST ref.
    np.testing.assert_allclose(np.asarray(out), np.asarray(ref), rtol=3e-2, atol=3e-2)
    print("KERNEL_OK")
</pallas_src>

<mosaic_0001>
module attributes {stable_mosaic.version = 11 : i64} {
  func.func @_bottleneck_kernel(%arg0: i32, %arg1: memref<1x8x256xf32, #tpu.memory_space<vmem>>, %arg2: memref<8x72xbf16, #tpu.memory_space<vmem>>, %arg3: memref<8x1xf32, #tpu.memory_space<vmem>>, %arg4: memref<8x72xbf16, #tpu.memory_space<vmem>>, %arg5: memref<8x1xf32, #tpu.memory_space<vmem>>, %arg6: memref<1x8x256xf32, #tpu.memory_space<vmem>>, %arg7: memref<8x512xf32, #tpu.memory_space<vmem>>, %arg8: memref<72x256xbf16, #tpu.memory_space<vmem>>) attributes {dimension_semantics = [#tpu.dimension_semantics<parallel>], iteration_bounds = array<i64: 2>, scalar_prefetch = 0 : i64, scratch_operands = 2 : i64, tpu.core_type = #tpu.core_type<tc>, window_params = [{transform_indices = @transform_0, window_bounds = array<i64: 1, 8, 256>}, {pipeline_mode = #tpu.pipeline_mode<synchronous>, transform_indices = @transform_1, window_bounds = array<i64: 8, 72>}, {pipeline_mode = #tpu.pipeline_mode<synchronous>, transform_indices = @transform_2, window_bounds = array<i64: 8, 1>}, {pipeline_mode = #tpu.pipeline_mode<synchronous>, transform_indices = @transform_3, window_bounds = array<i64: 8, 72>}, {pipeline_mode = #tpu.pipeline_mode<synchronous>, transform_indices = @transform_4, window_bounds = array<i64: 8, 1>}, {transform_indices = @transform_5, window_bounds = array<i64: 1, 8, 256>}]} {
    %cst = arith.constant 0.000000e+00 : f32
    %0 = vector.broadcast %cst : f32 to vector<8x128xf32>
    %c0 = arith.constant 0 : index
    %c0_0 = arith.constant 0 : index
    %1 = vector.load %arg7[%c0, %c0_0] : memref<8x512xf32, #tpu.memory_space<vmem>>, vector<8x128xf32>
    tpu.vector_store %arg7[%c0, %c0_0], %0 {strides = array<i32>} : memref<8x512xf32, #tpu.memory_space<vmem>>, vector<8x128xf32>,
    %cst_1 = arith.constant 0.000000e+00 : f32
    %2 = vector.broadcast %cst_1 : f32 to vector<8x128xf32>
    %c0_2 = arith.constant 0 : index
    %c384 = arith.constant 384 : index
    %3 = vector.load %arg7[%c0_2, %c384] : memref<8x512xf32, #tpu.memory_space<vmem>>, vector<8x128xf32>
    tpu.vector_store %arg7[%c0_2, %c384], %2 {strides = array<i32>} : memref<8x512xf32, #tpu.memory_space<vmem>>, vector<8x128xf32>,
    %c0_3 = arith.constant 0 : index
    %c0_4 = arith.constant 0 : index
    %c0_5 = arith.constant 0 : index
    %4 = vector.load %arg1[%c0_3, %c0_4, %c0_5] : memref<1x8x256xf32, #tpu.memory_space<vmem>>, vector<1x8x256xf32>
    %5 = vector.shape_cast %4 : vector<1x8x256xf32> to vector<8x256xf32>
    %c0_6 = arith.constant 0 : index
    %c128 = arith.constant 128 : index
    %6 = vector.load %arg7[%c0_6, %c128] : memref<8x512xf32, #tpu.memory_space<vmem>>, vector<8x256xf32>
    tpu.vector_store %arg7[%c0_6, %c128], %5 {strides = array<i32>} : memref<8x512xf32, #tpu.memory_space<vmem>>, vector<8x256xf32>,
    %7 = tpu.iota {dimensions = array<i32: 1>} : vector<1x256xi32>
    %c16_i32 = arith.constant 16 : i32
    %c0_i32 = arith.constant 0 : i32
    %8 = arith.cmpi eq, %c16_i32, %c0_i32 : i32
    %c1_i32 = arith.constant 1 : i32
    %9 = arith.select %8, %c1_i32, %c16_i32 : i32
    %10 = vector.broadcast %9 : i32 to vector<1x256xi32>
    %11 = arith.remsi %7, %10 : vector<1x256xi32>
    %c0_i32_7 = arith.constant 0 : i32
    %12 = vector.broadcast %c0_i32_7 : i32 to vector<1x256xi32>
    %13 = arith.cmpi ne, %11, %12 : vector<1x256xi32>
    %c0_i32_8 = arith.constant 0 : i32
    %14 = vector.broadcast %c0_i32_8 : i32 to vector<1x256xi32>
    %15 = arith.cmpi slt, %11, %14 : vector<1x256xi32>
    %c0_i32_9 = arith.constant 0 : i32
    %16 = arith.cmpi slt, %9, %c0_i32_9 : i32
    %17 = vector.broadcast %16 : i1 to vector<1x256xi1>
    %18 = vector.broadcast %17 : vector<1x256xi1> to vector<1x256xi1>
    %19 = arith.xori %15, %18 : vector<1x256xi1>
    %20 = arith.andi %19, %13 : vector<1x256xi1>
    %21 = vector.broadcast %9 : i32 to vector<1x256xi32>
    %22 = arith.addi %11, %21 : vector<1x256xi32>
    %23 = arith.select %20, %22, %11 : vector<1x256xi1>, vector<1x256xi32>
    %c1_i32_10 = arith.constant 1 : i32
    %24 = vector.broadcast %c1_i32_10 : i32 to vector<1x256xi32>
    %25 = arith.cmpi sge, %23, %24 : vector<1x256xi32>
    %c15_i32 = arith.constant 15 : i32
    %26 = vector.broadcast %c15_i32 : i32 to vector<1x256xi32>
    %27 = arith.cmpi slt, %23, %26 : vector<1x256xi32>
    %c0_11 = arith.constant 0 : index
    %c111 = arith.constant 111 : index
    %28 = vector.load %arg7[%c0_11, %c111] : memref<8x512xf32, #tpu.memory_space<vmem>>, vector<8x256xf32>
    %cst_12 = arith.constant 0.000000e+00 : f32
    %29 = vector.shape_cast %25 : vector<1x256xi1> to vector<1x256xi1>
    %30 = vector.broadcast %29 : vector<1x256xi1> to vector<8x256xi1>
    %31 = vector.broadcast %cst_12 : f32 to vector<8x256xf32>
    %32 = arith.select %30, %28, %31 : vector<8x256xi1>, vector<8x256xf32>
    %33 = arith.truncf %32 : vector<8x256xf32> to vector<8x256xbf16>
    %c0_13 = arith.constant 0 : index
    %c0_14 = arith.constant 0 : index
    %34 = vector.load %arg8[%c0_13, %c0_14] : memref<72x256xbf16, #tpu.memory_space<vmem>>, vector<8x256xbf16>
    tpu.vector_store %arg8[%c0_13, %c0_14], %33 {strides = array<i32>} : memref<72x256xbf16, #tpu.memory_space<vmem>>, vector<8x256xbf16>,
    %c0_15 = arith.constant 0 : index
    %c112 = arith.constant 112 : index
    %35 = vector.load %arg7[%c0_15, %c112] : memref<8x512xf32, #tpu.memory_space<vmem>>, vector<8x256xf32>
    %36 = arith.truncf %35 : vector<8x256xf32> to vector<8x256xbf16>
    %c8 = arith.constant 8 : index
    %c0_16 = arith.constant 0 : index
    %37 = vector.load %arg8[%c8, %c0_16] : memref<72x256xbf16, #tpu.memory_space<vmem>>, vector<8x256xbf16>
    tpu.vector_store %arg8[%c8, %c0_16], %36 {strides = array<i32>} : memref<72x256xbf16, #tpu.memory_space<vmem>>, vector<8x256xbf16>,
    %c0_17 = arith.constant 0 : index
    %c113 = arith.constant 113 : index
    %38 = vector.load %arg7[%c0_17, %c113] : memref<8x512xf32, #tpu.memory_space<vmem>>, vector<8x256xf32>
    %cst_18 = arith.constant 0.000000e+00 : f32
    %39 = vector.shape_cast %27 : vector<1x256xi1> to vector<1x256xi1>
    %40 = vector.broadcast %39 : vector<1x256xi1> to vector<8x256xi1>
    %41 = vector.broadcast %cst_18 : f32 to vector<8x256xf32>
    %42 = arith.select %40, %38, %41 : vector<8x256xi1>, vector<8x256xf32>
    %43 = arith.truncf %42 : vector<8x256xf32> to vector<8x256xbf16>
    %c16 = arith.constant 16 : index
    %c0_19 = arith.constant 0 : index
    %44 = vector.load %arg8[%c16, %c0_19] : memref<72x256xbf16, #tpu.memory_space<vmem>>, vector<8x256xbf16>
    tpu.vector_store %arg8[%c16, %c0_19], %43 {strides = array<i32>} : memref<72x256xbf16, #tpu.memory_space<vmem>>, vector<8x256xbf16>,
    %c0_20 = arith.constant 0 : index
    %c127 = arith.constant 127 : index
    %45 = vector.load %arg7[%c0_20, %c127] : memref<8x512xf32, #tpu.memory_space<vmem>>, vector<8x256xf32>
    %cst_21 = arith.constant 0.000000e+00 : f32
    %46 = vector.shape_cast %25 : vector<1x256xi1> to vector<1x256xi1>
    %47 = vector.broadcast %46 : vector<1x256xi1> to vector<8x256xi1>
    %48 = vector.broadcast %cst_21 : f32 to vector<8x256xf32>
    %49 = arith.select %47, %45, %48 : vector<8x256xi1>, vector<8x256xf32>
    %50 = arith.truncf %49 : vector<8x256xf32> to vector<8x256xbf16>
    %c24 = arith.constant 24 : index
    %c0_22 = arith.constant 0 : index
    %51 = vector.load %arg8[%c24, %c0_22] : memref<72x256xbf16, #tpu.memory_space<vmem>>, vector<8x256xbf16>
    tpu.vector_store %arg8[%c24, %c0_22], %50 {strides = array<i32>} : memref<72x256xbf16, #tpu.memory_space<vmem>>, vector<8x256xbf16>,
    %c0_23 = arith.constant 0 : index
    %c128_24 = arith.constant 128 : index
    %52 = vector.load %arg7[%c0_23, %c128_24] : memref<8x512xf32, #tpu.memory_space<vmem>>, vector<8x256xf32>
    %53 = arith.truncf %52 : vector<8x256xf32> to vector<8x256xbf16>
    %c32 = arith.constant 32 : index
    %c0_25 = arith.constant 0 : index
    %54 = vector.load %arg8[%c32, %c0_25] : memref<72x256xbf16, #tpu.memory_space<vmem>>, vector<8x256xbf16>
    tpu.vector_store %arg8[%c32, %c0_25], %53 {strides = array<i32>} : memref<72x256xbf16, #tpu.memory_space<vmem>>, vector<8x256xbf16>,
    %c0_26 = arith.constant 0 : index
    %c129 = arith.constant 129 : index
    %55 = vector.load %arg7[%c0_26, %c129] : memref<8x512xf32, #tpu.memory_space<vmem>>, vector<8x256xf32>
    %cst_27 = arith.constant 0.000000e+00 : f32
    %56 = vector.shape_cast %27 : vector<1x256xi1> to vector<1x256xi1>
    %57 = vector.broadcast %56 : vector<1x256xi1> to vector<8x256xi1>
    %58 = vector.broadcast %cst_27 : f32 to vector<8x256xf32>
    %59 = arith.select %57, %55, %58 : vector<8x256xi1>, vector<8x256xf32>
    %60 = arith.truncf %59 : vector<8x256xf32> to vector<8x256xbf16>
    %c40 = arith.constant 40 : index
    %c0_28 = arith.constant 0 : index
    %61 = vector.load %arg8[%c40, %c0_28] : memref<72x256xbf16, #tpu.memory_space<vmem>>, vector<8x256xbf16>
    tpu.vector_store %arg8[%c40, %c0_28], %60 {strides = array<i32>} : memref<72x256xbf16, #tpu.memory_space<vmem>>, vector<8x256xbf16>,
    %c0_29 = arith.constant 0 : index
    %c143 = arith.constant 143 : index
    %62 = vector.load %arg7[%c0_29, %c143] : memref<8x512xf32, #tpu.memory_space<vmem>>, vector<8x256xf32>
    %cst_30 = arith.constant 0.000000e+00 : f32
    %63 = vector.shape_cast %25 : vector<1x256xi1> to vector<1x256xi1>
    %64 = vector.broadcast %63 : vector<1x256xi1> to vector<8x256xi1>
    %65 = vector.broadcast %cst_30 : f32 to vector<8x256xf32>
    %66 = arith.select %64, %62, %65 : vector<8x256xi1>, vector<8x256xf32>
    %67 = arith.truncf %66 : vector<8x256xf32> to vector<8x256xbf16>
    %c48 = arith.constant 48 : index
    %c0_31 = arith.constant 0 : index
    %68 = vector.load %arg8[%c48, %c0_31] : memref<72x256xbf16, #tpu.memory_space<vmem>>, vector<8x256xbf16>
    tpu.vector_store %arg8[%c48, %c0_31], %67 {strides = array<i32>} : memref<72x256xbf16, #tpu.memory_space<vmem>>, vector<8x256xbf16>,
    %c0_32 = arith.constant 0 : index
    %c144 = arith.constant 144 : index
    %69 = vector.load %arg7[%c0_32, %c144] : memref<8x512xf32, #tpu.memory_space<vmem>>, vector<8x256xf32>
    %70 = arith.truncf %69 : vector<8x256xf32> to vector<8x256xbf16>
    %c56 = arith.constant 56 : index
    %c0_33 = arith.constant 0 : index
    %71 = vector.load %arg8[%c56, %c0_33] : memref<72x256xbf16, #tpu.memory_space<vmem>>, vector<8x256xbf16>
    tpu.vector_store %arg8[%c56, %c0_33], %70 {strides = array<i32>} : memref<72x256xbf16, #tpu.memory_space<vmem>>, vector<8x256xbf16>,
    %c0_34 = arith.constant 0 : index
    %c145 = arith.constant 145 : index
    %72 = vector.load %arg7[%c0_34, %c145] : memref<8x512xf32, #tpu.memory_space<vmem>>, vector<8x256xf32>
    %cst_35 = arith.constant 0.000000e+00 : f32
    %73 = vector.shape_cast %27 : vector<1x256xi1> to vector<1x256xi1>
    %74 = vector.broadcast %73 : vector<1x256xi1> to vector<8x256xi1>
    %75 = vector.broadcast %cst_35 : f32 to vector<8x256xf32>
    %76 = arith.select %74, %72, %75 : vector<8x256xi1>, vector<8x256xf32>
    %77 = arith.truncf %76 : vector<8x256xf32> to vector<8x256xbf16>
    %c64 = arith.constant 64 : index
    %c0_36 = arith.constant 0 : index
    %78 = vector.load %arg8[%c64, %c0_36] : memref<72x256xbf16, #tpu.memory_space<vmem>>, vector<8x256xbf16>
    tpu.vector_store %arg8[%c64, %c0_36], %77 {strides = array<i32>} : memref<72x256xbf16, #tpu.memory_space<vmem>>, vector<8x256xbf16>,
    %c0_37 = arith.constant 0 : index
    %c0_38 = arith.constant 0 : index
    %79 = vector.load %arg8[%c0_37, %c0_38] : memref<72x256xbf16, #tpu.memory_space<vmem>>, vector<72x256xbf16>
    %c0_39 = arith.constant 0 : index
    %c0_40 = arith.constant 0 : index
    %80 = vector.load %arg2[%c0_39, %c0_40] : memref<8x72xbf16, #tpu.memory_space<vmem>>, vector<8x72xbf16>
    %c0_41 = arith.constant 0 : index
    %c0_42 = arith.constant 0 : index
    %81 = vector.load %arg3[%c0_41, %c0_42] : memref<8x1xf32, #tpu.memory_space<vmem>>, vector<8x1xf32>
    %cst_43 = arith.constant dense<0.000000e+00> : vector<8x256xf32>
    %82 = tpu.matmul %80, %79, %cst_43 {dimension_numbers = #tpu.dot_dimension_numbers<[1], [0], [0], [1], [0, 0, 1, 1], [], []>} : vector<8x72xbf16>, vector<72x256xbf16>, vector<8x256xf32> -> vector<8x256xf32>
    %83 = vector.broadcast %81 : vector<8x1xf32> to vector<8x256xf32>
    %84 = arith.addf %82, %83 : vector<8x256xf32>
    %cst_44 = arith.constant 0.000000e+00 : f32
    %85 = vector.broadcast %cst_44 : f32 to vector<8x256xf32>
    %86 = arith.subf %85, %84 : vector<8x256xf32>
    %87 = math.exp %86 : vector<8x256xf32>
    %cst_45 = arith.constant 1.000000e+00 : f32
    %88 = vector.broadcast %cst_45 : f32 to vector<8x256xf32>
    %89 = arith.addf %88, %87 : vector<8x256xf32>
    %90 = tpu.reciprocal %89 {approx = true} : vector<8x256xf32> -> vector<8x256xf32>
    %91 = arith.mulf %84, %90 : vector<8x256xf32>
    %c0_46 = arith.constant 0 : index
    %c128_47 = arith.constant 128 : index
    %92 = vector.load %arg7[%c0_46, %c128_47] : memref<8x512xf32, #tpu.memory_space<vmem>>, vector<8x256xf32>
    tpu.vector_store %arg7[%c0_46, %c128_47], %91 {strides = array<i32>} : memref<8x512xf32, #tpu.memory_space<vmem>>, vector<8x256xf32>,
    %93 = tpu.iota {dimensions = array<i32: 1>} : vector<1x256xi32>
    %c16_i32_48 = arith.constant 16 : i32
    %c0_i32_49 = arith.constant 0 : i32
    %94 = arith.cmpi eq, %c16_i32_48, %c0_i32_49 : i32
    %c1_i32_50 = arith.constant 1 : i32
    %95 = arith.select %94, %c1_i32_50, %c16_i32_48 : i32
    %96 = vector.broadcast %95 : i32 to vector<1x256xi32>
    %97 = arith.remsi %93, %96 : vector<1x256xi32>
    %c0_i32_51 = arith.constant 0 : i32
    %98 = vector.broadcast %c0_i32_51 : i32 to vector<1x256xi32>
    %99 = arith.cmpi ne, %97, %98 : vector<1x256xi32>
    %c0_i32_52 = arith.constant 0 : i32
    %100 = vector.broadcast %c0_i32_52 : i32 to vector<1x256xi32>
    %101 = arith.cmpi slt, %97, %100 : vector<1x256xi32>
    %c0_i32_53 = arith.constant 0 : i32
    %102 = arith.cmpi slt, %95, %c0_i32_53 : i32
    %103 = vector.broadcast %102 : i1 to vector<1x256xi1>
    %104 = vector.broadcast %103 : vector<1x256xi1> to vector<1x256xi1>
    %105 = arith.xori %101, %104 : vector<1x256xi1>
    %106 = arith.andi %105, %99 : vector<1x256xi1>
    %107 = vector.broadcast %95 : i32 to vector<1x256xi32>
    %108 = arith.addi %97, %107 : vector<1x256xi32>
    %109 = arith.select %106, %108, %97 : vector<1x256xi1>, vector<1x256xi32>
    %c1_i32_54 = arith.constant 1 : i32
    %110 = vector.broadcast %c1_i32_54 : i32 to vector<1x256xi32>
    %111 = arith.cmpi sge, %109, %110 : vector<1x256xi32>
    %c15_i32_55 = arith.constant 15 : i32
    %112 = vector.broadcast %c15_i32_55 : i32 to vector<1x256xi32>
    %113 = arith.cmpi slt, %109, %112 : vector<1x256xi32>
    %c0_56 = arith.constant 0 : index
    %c111_57 = arith.constant 111 : index
    %114 = vector.load %arg7[%c0_56, %c111_57] : memref<8x512xf32, #tpu.memory_space<vmem>>, vector<8x256xf32>
    %cst_58 = arith.constant 0.000000e+00 : f32
    %115 = vector.shape_cast %111 : vector<1x256xi1> to vector<1x256xi1>
    %116 = vector.broadcast %115 : vector<1x256xi1> to vector<8x256xi1>
    %117 = vector.broadcast %cst_58 : f32 to vector<8x256xf32>
    %118 = arith.select %116, %114, %117 : vector<8x256xi1>, vector<8x256xf32>
    %119 = arith.truncf %118 : vector<8x256xf32> to vector<8x256xbf16>
    %c0_59 = arith.constant 0 : index
    %c0_60 = arith.constant 0 : index
    %120 = vector.load %arg8[%c0_59, %c0_60] : memref<72x256xbf16, #tpu.memory_space<vmem>>, vector<8x256xbf16>
    tpu.vector_store %arg8[%c0_59, %c0_60], %119 {strides = array<i32>} : memref<72x256xbf16, #tpu.memory_space<vmem>>, vector<8x256xbf16>,
    %c0_61 = arith.constant 0 : index
    %c112_62 = arith.constant 112 : index
    %121 = vector.load %arg7[%c0_61, %c112_62] : memref<8x512xf32, #tpu.memory_space<vmem>>, vector<8x256xf32>
    %122 = arith.truncf %121 : vector<8x256xf32> to vector<8x256xbf16>
    %c8_63 = arith.constant 8 : index
    %c0_64 = arith.constant 0 : index
    %123 = vector.load %arg8[%c8_63, %c0_64] : memref<72x256xbf16, #tpu.memory_space<vmem>>, vector<8x256xbf16>
    tpu.vector_store %arg8[%c8_63, %c0_64], %122 {strides = array<i32>} : memref<72x256xbf16, #tpu.memory_space<vmem>>, vector<8x256xbf16>,
    %c0_65 = arith.constant 0 : index
    %c113_66 = arith.constant 113 : index
    %124 = vector.load %arg7[%c0_65, %c113_66] : memref<8x512xf32, #tpu.memory_space<vmem>>, vector<8x256xf32>
    %cst_67 = arith.constant 0.000000e+00 : f32
    %125 = vector.shape_cast %113 : vector<1x256xi1> to vector<1x256xi1>
    %126 = vector.broadcast %125 : vector<1x256xi1> to vector<8x256xi1>
    %127 = vector.broadcast %cst_67 : f32 to vector<8x256xf32>
    %128 = arith.select %126, %124, %127 : vector<8x256xi1>, vector<8x256xf32>
    %129 = arith.truncf %128 : vector<8x256xf32> to vector<8x256xbf16>
    %c16_68 = arith.constant 16 : index
    %c0_69 = arith.constant 0 : index
    %130 = vector.load %arg8[%c16_68, %c0_69] : memref<72x256xbf16, #tpu.memory_space<vmem>>, vector<8x256xbf16>
    tpu.vector_store %arg8[%c16_68, %c0_69], %129 {strides = array<i32>} : memref<72x256xbf16, #tpu.memory_space<vmem>>, vector<8x256xbf16>,
    %c0_70 = arith.constant 0 : index
    %c127_71 = arith.constant 127 : index
    %131 = vector.load %arg7[%c0_70, %c127_71] : memref<8x512xf32, #tpu.memory_space<vmem>>, vector<8x256xf32>
    %cst_72 = arith.constant 0.000000e+00 : f32
    %132 = vector.shape_cast %111 : vector<1x256xi1> to vector<1x256xi1>
    %133 = vector.broadcast %132 : vector<1x256xi1> to vector<8x256xi1>
    %134 = vector.broadcast %cst_72 : f32 to vector<8x256xf32>
    %135 = arith.select %133, %131, %134 : vector<8x256xi1>, vector<8x256xf32>
    %136 = arith.truncf %135 : vector<8x256xf32> to vector<8x256xbf16>
    %c24_73 = arith.constant 24 : index
    %c0_74 = arith.constant 0 : index
    %137 = vector.load %arg8[%c24_73, %c0_74] : memref<72x256xbf16, #tpu.memory_space<vmem>>, vector<8x256xbf16>
    tpu.vector_store %arg8[%c24_73, %c0_74], %136 {strides = array<i32>} : memref<72x256xbf16, #tpu.memory_space<vmem>>, vector<8x256xbf16>,
    %c0_75 = arith.constant 0 : index
    %c128_76 = arith.constant 128 : index
    %138 = vector.load %arg7[%c0_75, %c128_76] : memref<8x512xf32, #tpu.memory_space<vmem>>, vector<8x256xf32>
    %139 = arith.truncf %138 : vector<8x256xf32> to vector<8x256xbf16>
    %c32_77 = arith.constant 32 : index
    %c0_78 = arith.constant 0 : index
    %140 = vector.load %arg8[%c32_77, %c0_78] : memref<72x256xbf16, #tpu.memory_space<vmem>>, vector<8x256xbf16>
    tpu.vector_store %arg8[%c32_77, %c0_78], %139 {strides = array<i32>} : memref<72x256xbf16, #tpu.memory_space<vmem>>, vector<8x256xbf16>,
    %c0_79 = arith.constant 0 : index
    %c129_80 = arith.constant 129 : index
    %141 = vector.load %arg7[%c0_79, %c129_80] : memref<8x512xf32, #tpu.memory_space<vmem>>, vector<8x256xf32>
    %cst_81 = arith.constant 0.000000e+00 : f32
    %142 = vector.shape_cast %113 : vector<1x256xi1> to vector<1x256xi1>
    %143 = vector.broadcast %142 : vector<1x256xi1> to vector<8x256xi1>
    %144 = vector.broadcast %cst_81 : f32 to vector<8x256xf32>
    %145 = arith.select %143, %141, %144 : vector<8x256xi1>, vector<8x256xf32>
    %146 = arith.truncf %145 : vector<8x256xf32> to vector<8x256xbf16>
    %c40_82 = arith.constant 40 : index
    %c0_83 = arith.constant 0 : index
    %147 = vector.load %arg8[%c40_82, %c0_83] : memref<72x256xbf16, #tpu.memory_space<vmem>>, vector<8x256xbf16>
    tpu.vector_store %arg8[%c40_82, %c0_83], %146 {strides = array<i32>} : memref<72x256xbf16, #tpu.memory_space<vmem>>, vector<8x256xbf16>,
    %c0_84 = arith.constant 0 : index
    %c143_85 = arith.constant 143 : index
    %148 = vector.load %arg7[%c0_84, %c143_85] : memref<8x512xf32, #tpu.memory_space<vmem>>, vector<8x256xf32>
    %cst_86 = arith.constant 0.000000e+00 : f32
    %149 = vector.shape_cast %111 : vector<1x256xi1> to vector<1x256xi1>
    %150 = vector.broadcast %149 : vector<1x256xi1> to vector<8x256xi1>
    %151 = vector.broadcast %cst_86 : f32 to vector<8x256xf32>
    %152 = arith.select %150, %148, %151 : vector<8x256xi1>, vector<8x256xf32>
    %153 = arith.truncf %152 : vector<8x256xf32> to vector<8x256xbf16>
    %c48_87 = arith.constant 48 : index
    %c0_88 = arith.constant 0 : index
    %154 = vector.load %arg8[%c48_87, %c0_88] : memref<72x256xbf16, #tpu.memory_space<vmem>>, vector<8x256xbf16>
    tpu.vector_store %arg8[%c48_87, %c0_88], %153 {strides = array<i32>} : memref<72x256xbf16, #tpu.memory_space<vmem>>, vector<8x256xbf16>,
    %c0_89 = arith.constant 0 : index
    %c144_90 = arith.constant 144 : index
    %155 = vector.load %arg7[%c0_89, %c144_90] : memref<8x512xf32, #tpu.memory_space<vmem>>, vector<8x256xf32>
    %156 = arith.truncf %155 : vector<8x256xf32> to vector<8x256xbf16>
    %c56_91 = arith.constant 56 : index
    %c0_92 = arith.constant 0 : index
    %157 = vector.load %arg8[%c56_91, %c0_92] : memref<72x256xbf16, #tpu.memory_space<vmem>>, vector<8x256xbf16>
    tpu.vector_store %arg8[%c56_91, %c0_92], %156 {strides = array<i32>} : memref<72x256xbf16, #tpu.memory_space<vmem>>, vector<8x256xbf16>,
    %c0_93 = arith.constant 0 : index
    %c145_94 = arith.constant 145 : index
    %158 = vector.load %arg7[%c0_93, %c145_94] : memref<8x512xf32, #tpu.memory_space<vmem>>, vector<8x256xf32>
    %cst_95 = arith.constant 0.000000e+00 : f32
    %159 = vector.shape_cast %113 : vector<1x256xi1> to vector<1x256xi1>
    %160 = vector.broadcast %159 : vector<1x256xi1> to vector<8x256xi1>
    %161 = vector.broadcast %cst_95 : f32 to vector<8x256xf32>
    %162 = arith.select %160, %158, %161 : vector<8x256xi1>, vector<8x256xf32>
    %163 = arith.truncf %162 : vector<8x256xf32> to vector<8x256xbf16>
    %c64_96 = arith.constant 64 : index
    %c0_97 = arith.constant 0 : index
    %164 = vector.load %arg8[%c64_96, %c0_97] : memref<72x256xbf16, #tpu.memory_space<vmem>>, vector<8x256xbf16>
    tpu.vector_store %arg8[%c64_96, %c0_97], %163 {strides = array<i32>} : memref<72x256xbf16, #tpu.memory_space<vmem>>, vector<8x256xbf16>,
    %c0_98 = arith.constant 0 : index
    %c0_99 = arith.constant 0 : index
    %165 = vector.load %arg8[%c0_98, %c0_99] : memref<72x256xbf16, #tpu.memory_space<vmem>>, vector<72x256xbf16>
    %c0_100 = arith.constant 0 : index
    %c0_101 = arith.constant 0 : index
    %166 = vector.load %arg4[%c0_100, %c0_101] : memref<8x72xbf16, #tpu.memory_space<vmem>>, vector<8x72xbf16>
    %c0_102 = arith.constant 0 : index
    %c0_103 = arith.constant 0 : index
    %167 = vector.load %arg5[%c0_102, %c0_103] : memref<8x1xf32, #tpu.memory_space<vmem>>, vector<8x1xf32>
    %cst_104 = arith.constant dense<0.000000e+00> : vector<8x256xf32>
    %168 = tpu.matmul %166, %165, %cst_104 {dimension_numbers = #tpu.dot_dimension_numbers<[1], [0], [0], [1], [0, 0, 1, 1], [], []>} : vector<8x72xbf16>, vector<72x256xbf16>, vector<8x256xf32> -> vector<8x256xf32>
    %169 = vector.broadcast %167 : vector<8x1xf32> to vector<8x256xf32>
    %170 = arith.addf %168, %169 : vector<8x256xf32>
    %cst_105 = arith.constant 0.000000e+00 : f32
    %171 = vector.broadcast %cst_105 : f32 to vector<8x256xf32>
    %172 = arith.subf %171, %170 : vector<8x256xf32>
    %173 = math.exp %172 : vector<8x256xf32>
    %cst_106 = arith.constant 1.000000e+00 : f32
    %174 = vector.broadcast %cst_106 : f32 to vector<8x256xf32>
    %175 = arith.addf %174, %173 : vector<8x256xf32>
    %176 = tpu.reciprocal %175 {approx = true} : vector<8x256xf32> -> vector<8x256xf32>
    %177 = arith.mulf %170, %176 : vector<8x256xf32>
    %178 = arith.addf %177, %5 : vector<8x256xf32>
    %c0_107 = arith.constant 0 : index
    %c0_108 = arith.constant 0 : index
    %c0_109 = arith.constant 0 : index
    %179 = vector.load %arg6[%c0_107, %c0_108, %c0_109] : memref<1x8x256xf32, #tpu.memory_space<vmem>>, vector<1x8x256xf32>
    %180 = vector.shape_cast %179 : vector<1x8x256xf32> to vector<8x256xf32>
    %181 = vector.shape_cast %178 : vector<8x256xf32> to vector<1x8x256xf32>
    tpu.vector_store %arg6[%c0_107, %c0_108, %c0_109], %181 {strides = array<i32>} : memref<1x8x256xf32, #tpu.memory_space<vmem>>, vector<1x8x256xf32>,
    return
  }
  func.func @transform_0(%arg0: i32) -> (i32, i32, i32) {
    %c0_i32 = arith.constant 0 : i32
    %c0_i32_0 = arith.constant 0 : i32
    %c0_i32_1 = arith.constant 0 : i32
    return %arg0, %c0_i32, %c0_i32_0 : i32, i32, i32
  }
  func.func @transform_1(%arg0: i32) -> (i32, i32) {
    %c0_i32 = arith.constant 0 : i32
    %c0_i32_0 = arith.constant 0 : i32
    %c0_i32_1 = arith.constant 0 : i32
    return %c0_i32, %c0_i32_0 : i32, i32
  }
  func.func @transform_2(%arg0: i32) -> (i32, i32) {
    %c0_i32 = arith.constant 0 : i32
    %c0_i32_0 = arith.constant 0 : i32
    %c0_i32_1 = arith.constant 0 : i32
    return %c0_i32, %c0_i32_0 : i32, i32
  }
  func.func @transform_3(%arg0: i32) -> (i32, i32) {
    %c0_i32 = arith.constant 0 : i32
    %c0_i32_0 = arith.constant 0 : i32
    %c0_i32_1 = arith.constant 0 : i32
    return %c0_i32, %c0_i32_0 : i32, i32
  }
  func.func @transform_4(%arg0: i32) -> (i32, i32) {
    %c0_i32 = arith.constant 0 : i32
    %c0_i32_0 = arith.constant 0 : i32
    %c0_i32_1 = arith.constant 0 : i32
    return %c0_i32, %c0_i32_0 : i32, i32
  }
  func.func @transform_5(%arg0: i32) -> (i32, i32, i32) {
    %c0_i32 = arith.constant 0 : i32
    %c0_i32_0 = arith.constant 0 : i32
    %c0_i32_1 = arith.constant 0 : i32
    return %arg0, %c0_i32, %c0_i32_0 : i32, i32, i32
  }
}

</mosaic_0001>

<bundles_post_ra>
// kernel: tpu_custom_call.1
= control target key start
LH: loop header
LB: loop body
LE: loop exit
PB: predicated region body
PF: predicated region fallthrough
CT: control target
= control target key end

     0   :  { %10 = vsyncpa [#allocation5], 0  ;;  %s1861_s0 = inlined_call_operand.hbm [shape: f32[2,8,256], index: 0, kind: input, shape index: {}]   ;;  %s1862_s1 = inlined_call_operand.vmem [shape: bf16[8,72], index: 1, kind: input, shape index: {}]   ;;  %s1863_s2 = inlined_call_operand.vmem [shape: f32[8,1], index: 2, kind: input, shape index: {}]   ;;  %s1864_s3 = inlined_call_operand.vmem [shape: bf16[8,72], index: 3, kind: input, shape index: {}]   ;;  %s1865_s4 = inlined_call_operand.vmem [shape: f32[8,1], index: 4, kind: input, shape index: {}]   ;;  %s1866_s5 = inlined_call_operand.hbm [shape: f32[2,8,256], index: 5, kind: output, shape index: {}]  }
   0x1   :  { %12 = vsyncpa [#allocation5 + $0x1], 0 }
   0x2   :  { %13 = vsyncpa [#allocation6], 0 }
   0x3   :  { %15 = vsyncpa [#allocation6 + $0x1], 0  ;;  %s1474_s18 = smov 0   ;;  %s1476_s19 = smov 0  }
   0x4   :  { %s1478_s20 = smov 0   ;;  %s1480_s21 = smov 0  }
   0x5 LB: > { %s1495_s22 = sadd.s32 4294967295, %s1428_s21   ;;  %s1077_s23 = sadd.s32 4294967294, %s1428_s21   ;;  %s1428_s21 = sphi %s1480_s21, %s1897_s21   ;;  %s1424_s20 = sphi %s1478_s20, %s1896_s20   ;;  %s1420_s19 = sphi %s1476_s19, %s1895_s19   ;;  %s1416_s18 = sphi %s1474_s18, %s1894_s18  }
   0x6   : > { %s1499_s24 = sadd.s32 1, %s1428_s21   ;;  %s28_s25 = sadd.s32 1, %s1424_s20 }
   0x7   : > { %s25_s26 = ssub.s32 %s1428_s21, %s1499_s24  ;;  %p35_p0 = scmp.ne.s32.totalorder %s1424_s20, %s1420_s19 }
   0x8   : > { %p26_p1 = scmp.eq.s32.totalorder %s25_s26, 0  ;;  %p36_p2 = scmp.eq.s32.totalorder %s1428_s21, 0 }
   0x9   : > { %p41_p3 = scmp.ne.s32.totalorder %s1420_s19, %s1416_s18  ;;  %p42_p4 = scmp.eq.s32.totalorder %s1495_s22, 0 }
   0xa   : > { %s1511_s27 = scalar_select %p26_p1, %s1424_s20, %s28_s25  }
   0xb   : > { %p1513_p5 = por %p36_p2, %p35_p0  ;;  %p1517_p6 = por %p42_p4, %p41_p3 }
   0xc   : > { %p149_p7 = scmp.eq.s32.totalorder %s1495_s22, 1  ;;  %p155_p8 = scmp.eq.s32.totalorder %s1077_s23, 1 }
   0xd   : > { %p1209_p10 = scmp.lt.s32.totalorder %s1428_s21, 2  ;;  %s187_s7 = sand.u32 1, %s1424_s20  }
   0xe   : > { %p1524_p11 = por %p149_p7, %p35_p0  ;;  %p1528_p12 = por %p155_p8, %p41_p3 }
   0xf   : > { %s1137_s8 = sshll.u32 %s1428_s21, 8  ;;  %s1080_s9 = sshll.u32 %s187_s7, 4 }
  0x10   : > { %s1872_s30 = scalar_select %p1524_p11, 1, 0 }
  0x11   : > { %s1873_s6 = scalar_select %p1528_p12, 1, 0 }
  0x12   : > { %s1537_s12 = scalar_lea.hbm %s1861_s0, %s1137_s8  ;;  %s191_s13 = scalar_lea.vmem [#allocation4], %s1080_s9 }
  0x13   : > { %s199_s14 = sshll.u32 %s191_s13, 4  ;;  %p1541_p13 = pnand %p1209_p10, %p1513_p5  ;;  %s1545_s14 = int_to_ptr.vmem [resolvable:$true] %s199_s14 }
  0x14   : > { %s188_s16 = scalar_lea.sflag [#allocation5], %s187_s7  ;;  %s1332_s17 = scalar_lea.hbm %s1537_s12, 256 }
  0x15   : > { %p1333_p2 = scmp.ne.s32.totalorder %s1537_s12, %s1332_s17  ;;  %p1334_p3 = pneg %p1541_p13 }
  0x16   : > { %s1337_s26 = scalar_lea.hbm %s1861_s0, 512  ;;  %p1338_p5 = scmp.lt.u32.totalorder %s1537_s12, %s1861_s0 }
  0x17   : > { %p1335_p4 = pnand %p1334_p3, %p1333_p2  ;;  %p1339_p8 = scmp.lt.u32.totalorder %s1337_s26, %s1332_s17 }
  0x18   : > { %p1341_p9 = scmp.lt.u32.totalorder %s1332_s17, %s1537_s12 }
  0x19   : > { %p1336_p7 = pneg %p1335_p4  ;;  %p1340_p10 = por %p1339_p8, %p1338_p5 }
  0x1b   : > { %p1342_p0 = por %p1341_p9, %p1340_p10 }
  0x1d   : > { %p1343_p1 = pnand %p1342_p0, %p1336_p7 }
  0x1f   : > { %1346 = shalt.err (!%p1343_p1)
}
  0x20   : > { %s1347_s7 = scalar_lea.vmem %s1545_s14, 256  ;;  %s1430_s9 = smov [#allocation4]  }
  0x21   : > { %p1348_p2 = scmp.ne.s32.totalorder %s1545_s14, %s1347_s7  ;;  %s1352_s10 = sshll.u32 %s1430_s9, 4  ;;  %s1353_s10 = int_to_ptr.vmem [resolvable:$false] %s1352_s10 }
  0x22   : > { %s1354_s11 = scalar_lea.vmem %s1353_s10, 512  ;;  %p1355_p11 = scmp.lt.s32.totalorder %s1545_s14, %s1353_s10 }
  0x23   : > { %p1350_p4 = pnand %p1348_p2, %p1334_p3  ;;  %p1356_p5 = scmp.lt.s32.totalorder %s1354_s11, %s1347_s7 }
  0x25   : > { %p1351_p12 = pneg %p1350_p4  ;;  %p1357_p8 = por %p1356_p5, %p1355_p11 }
  0x27   : > { %p1358_p9 = pnand %p1357_p8, %p1351_p12 }
  0x29   : > { %1361 = shalt.err (!%p1358_p9)
}
  0x2a   : > { %1204 = dma.hbm_to_vmem [thread:$0]  (!%p1541_p13), %s1537_s12, 256, %s1545_s14, %s188_s16  }
  0x2b   : > { %p1875_p0 = scmp.lt.s32.totalorder %s1428_s21, 3  ;;  %p1876_p1 = scmp.ge.s32.totalorder %s1428_s21, 1 }
  0x2d   : > { %p205_p3 = pnand %p1876_p1, %p1875_p0 }
  0x2e   : > { %s1579_s13 = sand.u32 (!%p205_p3), 1, %s1420_s19  }
  0x2f   : > { %208 = sbr.rel (%p205_p3) target bundleno = 871 (0x367), region = 40  ;;  %s1084_s17 = sshll.u32 (!%p205_p3), %s1579_s13, 4 }
  0x30   : > { %s211_s23 = scalar_lea.sflag (!%p205_p3), [#allocation5], %s1579_s13  ;;  %s214_s15 = scalar_lea.vmem (!%p205_p3), [#allocation4], %s1084_s17 }
  0x36   : > { %1407 = dma.done.wait (%p1517_p6), %s211_s23, 256  }
  0x37   : > { %1409 = vsyncadd (%p1517_p6), %s211_s23, 4294967040  ;;  %v1589_v0 = vld [vmem:[%s214_s15] sm:$0xff]  ;;  %v1591_v1 = vld [vmem:[%s214_s15 + $0x8] sm:$0xff]  ;;  %v1431_v3 = vmov 0.0   ;;  %s1432_s12 = smov 1   ;;  %s1433_s14 = smov 17   ;;  %v248_v12 = vlaneseq }
  0x38   : > { %v1265_v2 = vpack.i.bf16 %v1591_v1, %v1589_v0  ;;  %v1255_v4 = vpack.i.bf16 %v1589_v0, %v1431_v3  ;;  %v1139_v5 = vpack.c.bf16 %v1589_v0, %v1431_v3  ;;  %s1434_s29 = smov 16   ;;  %v1140_v6 = vpack.c.bf16 %v1591_v1, %v1591_v1  ;;  %s1435_s16 = smov 15   ;;  %v527_v11 = vld [vmem:[%s1863_s2] sm:$0xff] }
  0x39   : > { %v1270_v7 = vpack.i.bf16 %v1431_v3, %v1591_v1  ;;  %s1436_s25 = smov 127   ;;  %s1437_s26 = smov 113   ;;  %v1143_v8 = vpack.c.bf16 %v1591_v1, %v1589_v0  ;;  %v1438_v9 = vmov 0   ;;  %v1440_v10 = vmov 0.0|0.0   ;;  %v874_v47 = vld [vmem:[%s1864_s3] sm:$0xf] }
  0x3a   : > { %1266 = vrot.lane.b32.xlu1 %v1265_v2, %s1432_s12  ;;  %1256 = vrot.lane.b32.xlu0 %v1255_v4, %s1433_s14  ;;  %s1439_s28 = smov 112   ;;  %s1441_s8 = smov 111   ;;  %v249_v13 = vand.u32 127, %v248_v12  ;;  %vm295_vm0 = vcmask 138240   ;;  %vm353_vm3 = vcmask 121856   ;;  %vm331_vm4 = vcmask 1043456  }
  0x3b   : > { %621 = vmatprep.mubr.bf16.mxu0 %v1438_v9  ;;  %1285 = vset.pattern.permute.xlu0 %v1438_v9  ;;  %vm333_vm5 = vcmask 130048   ;;  %vm381_vm6 = vcmask 7168   ;;  %vm420_vm10 = vcmask 1039360   ;;  %vm1442_vm12 = vmmov 1   ;;  %p1891_p11 = scmp.ne.s32.totalorder %s1872_s30, 0  ;;  %s1443_s7 = smov [#allocation7]  }
  0x3c   : > { %967 = vmatprep.mubr.bf16.mxu1 %v1438_v9  ;;  %v250_v14 = vadd.s32 128, %v249_v13  ;;  %v255_v20 = vand.u32 15, %v249_v13  ;;  %vm448_vm14 = vcmask 924672   ;;  %s1366_s9 = sshll.u32 %s1443_s7, 4  ;;  %s1367_s9 = int_to_ptr.vmem [resolvable:$false] %s1366_s9 }
  0x3d   : > { %s1368_s10 = scalar_lea.vmem %s1367_s9, 512 }
  0x3e   : > { %293 = vrot.lane.b32.xlu0 %v1591_v1, %s1433_s14  ;;  %325 = vrot.lane.b32.xlu1 %v1139_v5, %s1434_s29  ;;  %v262_v17 = vand.u32 15, %v250_v14  ;;  %vm1640_vm2 = vcmp.ge.s32.totalorder %v255_v20, 1  ;;  %vm1661_vm9 = vcmp.lt.s32.totalorder %v255_v20, 15 }
  0x3f   : > { %vm1868_vm11 = vmpackc.low %vm1640_vm2, %vm1661_vm9 }
  0x40   : > { %vm1635_vm1 = vcmp.ge.s32.totalorder %v262_v17, 1  ;;  %vm1650_vm7 = vcmp.lt.s32.totalorder %v262_v17, 15  ;;  %vm1692_vm15 = vmpackc.low %vm1661_vm9, %vm1442_vm12 }
  0x41   : > { %vm1167_vm8 = vmpackc.low %vm1635_vm1, %vm1650_vm7 }
  0x42   : > { %1261 = vrot.lane.b32.xlu0 %v1265_v2, %s1435_s16  ;;  %327 = vrot.lane.b32.xlu1 %v1140_v6, %s1434_s29  ;;  %vm1680_vm13 = vmpackc.low %vm1650_vm7, %vm1442_vm12  ;;  %vm1869_vm12 = vcmask 916480  }
  0x46   : > { %347 = vrot.lane.b32.xlu0 %v1431_v3, %s1435_s16  ;;  %375 = vrot.lane.b32.xlu1 %v1431_v3, %s1432_s12 }
  0x4a   : > { %1271 = vrot.lane.b32.xlu0 %v1270_v7, %s1436_s25  ;;  %414 = vrot.lane.b32.xlu1 %v1589_v0, %s1436_s25 }
  0x4e   : > { %1276 = vrot.lane.b32.xlu0 %v1265_v2, %s1437_s26  ;;  %446 = vrot.lane.b32.xlu1 %v1431_v3, %s1437_s26 }
  0x52   : > { %478 = vrot.lane.b32.xlu0 %v1143_v8, %s1439_s28  ;;  %480 = vrot.lane.b32.xlu1 %v1440_v10, %s1439_s28 }
  0x56   : > { %1281 = vrot.lane.b32.xlu0 %v1265_v2, %s1441_s8  ;;  %499 = vrot.lane.b32.xlu1 %v1431_v3, %s1441_s8 }
  0x5a   : > { %530 = vperm.xlu0 %1285, %v527_v11   ;;  %728 = vrot.lane.b32.xlu1 %v1431_v3, %s1432_s12 }
  0x5e   : > { %701 = vrot.lane.b32.xlu0 %v1431_v3, %s1435_s16 }
  0xac   : > { %v1267_v15 = vpop.permute.xlu1 %1266  ;;  %v1257_v16 = vpop.permute.xlu0 %1256 }
  0xad   : > { %v1259_v18 = vunpack.i.h.bf16 %v1257_v16  ;;  %v1258_v19 = vunpack.i.l.bf16 %v1257_v16  ;;  %v1269_v34 = vunpack.i.h.bf16 %v1267_v15  ;;  %v1268_v35 = vunpack.i.l.bf16 %v1267_v15 }
  0xaf   : > { %v296_v26 = vsel %vm295_vm0, %v1258_v19, %v1259_v18  ;;  %v383_v46 = vsel %vm381_vm6, %v1268_v35, %v1269_v34 }
  0xb0   : > { %v294_v21 = vpop.permute.xlu0 %293  ;;  %v326_v22 = vpop.permute.xlu1 %325  ;;  %v300_v36 = vsel %vm1640_vm2, %v296_v26, 0.0 }
  0xb1   : > { %v297_v24 = vsel %vm295_vm0, %v1259_v18, %v294_v21  ;;  %v329_v30 = vrot.slane %v326_v22, 4 }
  0xb2   : > { %v301_v27 = vsel %vm1635_vm1, %v297_v24, 0.0 }
  0xb3   : > { %v1138_v37 = vpack.c.bf16 %v301_v27, %v300_v36 }
  0xb4   : > { %v1262_v28 = vpop.permute.xlu0 %1261  ;;  %v328_v29 = vpop.permute.xlu1 %327 }
  0xb5   : > { %v1264_v31 = vunpack.i.h.bf16 %v1262_v28  ;;  %v1263_v32 = vunpack.i.l.bf16 %v1262_v28  ;;  %v330_v33 = vrot.slane %v328_v29, 4 }
  0xb7   : > { %v332_v38 = vsel %vm331_vm4, %v329_v30, %v330_v33  ;;  %v355_v43 = vsel %vm353_vm3, %v1263_v32, %v1264_v31 }
  0xb8   : > { %v348_v40 = vpop.permute.xlu0 %347  ;;  %v376_v41 = vpop.permute.xlu1 %375  ;;  %v334_v42 = vsel %vm333_vm5, %v326_v22, %v332_v38  ;;  %v1168_v50 = vpack.c.bf16 %v383_v46, %v355_v43 }
  0xb9   : > { %v1098_v44 = vcombine.high %v1138_v37, %v334_v42  ;;  %v1097_v45 = vcombine.low %v1138_v37, %v334_v42  ;;  %v354_v48 = vsel %vm353_vm3, %v348_v40, %v1263_v32  ;;  %v382_v49 = vsel %vm381_vm6, %v376_v41, %v1268_v35  ;;  %v526_v32 = vld [vmem:[%s1862_s1] sm:$0xf] }
  0xba   : > { %v1171_v55 = vpack.c.bf16 %v382_v49, %v354_v48 }
  0xbb   : > { %589 = vmatprep.subr.bf16.mxu0 %v1098_v44 }
  0xbc   : > { %v1272_v51 = vpop.permute.xlu0 %1271  ;;  %590 = vmatpush1.bf16.msra.mxu0 %v1097_v45  ;;  %v415_v52 = vpop.permute.xlu1 %414 }
  0xbd   : > { %v1274_v53 = vunpack.i.h.bf16 %v1272_v51  ;;  %v1273_v54 = vunpack.i.l.bf16 %v1272_v51  ;;  %1169 = vmatprep.subr.msk.bf16.mxu0 %vm1167_vm8, %v1168_v50 }
  0xbf   : > { %v421_v56 = vsel %vm420_vm10, %v415_v52, %v1273_v54  ;;  %v422_v57 = vsel %vm420_vm10, %v1273_v54, %v1274_v53 }
  0xc0   : > { %v1277_v59 = vpop.permute.xlu0 %1276  ;;  %1172 = vmatpush1.bf16.msk.msra.mxu0 %vm1868_vm11, %v1171_v55  ;;  %v447_v60 = vpop.permute.xlu1 %446  ;;  %v1174_v61 = vpack.c.bf16 %v422_v57, %v1591_v1  ;;  %v1177_v4 = vpack.c.bf16 %v421_v56, %v1589_v0  ;;  %vm501_vm11 = vcmask 908288  }
  0xc1   : > { %v1279_v62 = vunpack.i.h.bf16 %v1277_v59  ;;  %v1278_v63 = vunpack.i.l.bf16 %v1277_v59 }
  0xc2   : > { %1175 = vmatprep.subr.msk.bf16.mxu0 %vm1680_vm13, %v1174_v61  ;;  %v875_v61 = vld [vmem:[%s1865_s4] sm:$0xff] }
  0xc3   : > { %v449_v5 = vsel %vm448_vm14, %v1278_v63, %v1279_v62  ;;  %v450_v6 = vsel %vm448_vm14, %v1279_v62, %v447_v60 }
  0xc4   : > { %v453_v7 = vsel %vm1640_vm2, %v449_v5, 0.0  ;;  %v454_v8 = vsel %vm1635_vm1, %v450_v6, 0.0  ;;  %v479_v9 = vpop.permute.xlu0 %478  ;;  %1178 = vmatpush1.bf16.msk.msra.mxu0 %vm1692_vm15, %v1177_v4  ;;  %v481_v11 = vpop.permute.xlu1 %480 }
  0xc5   : > { %v482_v12 = vrot.slane %v479_v9, 4  ;;  %v483_v13 = vrot.slane %v481_v11, 4  ;;  %v1145_v14 = vpack.c.bf16 %v454_v8, %v453_v7 }
  0xc7   : > { %v484_v15 = vsel %vm331_vm4, %v482_v12, %v483_v13 }
  0xc8   : > { %v1282_v16 = vpop.permute.xlu0 %1281  ;;  %v500_v17 = vpop.permute.xlu1 %499  ;;  %v486_v18 = vsel %vm1869_vm12, %v479_v9, %v484_v15  ;;  %vm578_vm12 = vcmask 588800  }
  0xc9   : > { %v1284_v19 = vunpack.i.h.bf16 %v1282_v16  ;;  %v1283_v20 = vunpack.i.l.bf16 %v1282_v16  ;;  %v1104_v21 = vcombine.high %v1145_v14, %v486_v18  ;;  %v1103_v22 = vcombine.low %v1145_v14, %v486_v18 }
  0xcb   : > { %v503_v24 = vsel %vm501_vm11, %v1284_v19, %v500_v17  ;;  %595 = vmatprep.subr.bf16.mxu0 %v1104_v21  ;;  %v502_v26 = vsel %vm501_vm11, %v1283_v20, %v1284_v19 }
  0xcc   : > { %v507_v27 = vsel %vm1650_vm7, %v503_v24, 0.0  ;;  %596 = vmatpush1.bf16.msra.mxu0 %v1103_v22  ;;  %v506_v28 = vsel %vm1661_vm9, %v502_v26, 0.0  ;;  %v729_v62 = vpop.permute.xlu1 %728 }
  0xcd   : > { %v1166_v29 = vpack.c.bf16 %v507_v27, %v507_v27  ;;  %v1165_v30 = vpack.c.bf16 %v506_v28, %v506_v28 }
  0xcf   : > { %1107 = vmatprep.subr.msk.bf16.mxu0 %vm331_vm4, %v1166_v29  ;;  %v584_v31 = vsel %vm331_vm4, %v1165_v30, 0 }
  0xd0   : > { %598 = vmatpush1.bf16.msra.mxu0 %v584_v31 }
  0xd3   : > { %1108 = vmatmul.mubr.msk.bf16.vlgmr.msra.gmra.mrb[0].mxu0 %vm578_vm12, %v526_v32 }
  0xd9   : > { %v531_v33 = vpop.permute.xlu0 %530 }
  0xdd   : > { %v702_v63 = vpop.permute.xlu0 %701 }
 0x1a6   : > { %v623_v34 = vpop.f32.mrb[0].mxu0 }
 0x1a7   : > { %v624_v35 = vadd.f32 %v623_v34, %v531_v33  ;;  %v625_v36 = vpop.f32.mrb[1].mxu0 }
 0x1a8   : > { %v626_v37 = vadd.f32 %v625_v36, %v531_v33  ;;  %v627_v38 = vpop.f32.mrb[2].mxu0 }
 0x1a9   : > { %v630_v40 = vsub.f32 0.0, %v624_v35  ;;  %v628_v41 = vpop.f32.mrb[3].mxu0 }
 0x1aa   : > { %v631_v42 = vsub.f32 0.0, %v626_v37 }
 0x1ab   : > { %v632_v43 = vmul.f32 1.442695, %v630_v40 }
 0x1ac   : > { %v634_v44 = vmul.f32 1.442695, %v631_v42 }
 0x1ad   : > { %1316 = vpow2.f32 %v632_v43 }
 0x1ae   : > { %1318 = vpow2.f32 %v634_v44 }
 0x1b7   : > { %v1317_v45 = vpop.eup %1316 }
 0x1b8   : > { %v1319_v46 = vpop.eup %1318  ;;  %v636_v48 = vadd.f32 1.0, %v1317_v45 }
 0x1b9   : > { %v637_v49 = vadd.f32 1.0, %v1319_v46 }
 0x1ba   : > { %1320 = vrcp.f32 %v636_v48 }
 0x1bb   : > { %1322 = vrcp.f32 %v637_v49 }
 0x1c4   : > { %v1321_v50 = vpop.eup %1320 }
 0x1c5   : > { %v1323_v51 = vpop.eup %1322  ;;  %v1721_v52 = vmul.f32 %v1321_v50, %v624_v35 }
 0x1c6   : > { %v1723_v53 = vmul.f32 %v1323_v51, %v626_v37 }
 0x1c7   : > { %v1286_v54 = vpack.i.bf16 %v1721_v52, %v1431_v3  ;;  %v1150_v56 = vpack.c.bf16 %v1721_v52, %v1431_v3 }
 0x1c8   : > { %v1291_v55 = vpack.i.bf16 %v1723_v53, %v1721_v52  ;;  %v1301_v57 = vpack.i.bf16 %v1431_v3, %v1723_v53  ;;  %v1151_v59 = vpack.c.bf16 %v1723_v53, %v1723_v53  ;;  %v1154_v60 = vpack.c.bf16 %v1723_v53, %v1721_v52 }
 0x1c9   : > { %1287 = vrot.lane.b32.xlu1 %v1286_v54, %s1433_s14 }
 0x1ca   : > { %1292 = vrot.lane.b32.xlu0 %v1291_v55, %s1435_s16  ;;  %s240_s16 = scalar_lea.vmem [#allocation7], %s1084_s17 }
 0x1cd   : > { %654 = vrot.lane.b32.xlu1 %v1723_v53, %s1433_s14 }
 0x1ce   : > { %685 = vrot.lane.b32.xlu0 %v1150_v56, %s1434_s29 }
 0x1d1   : > { %1297 = vrot.lane.b32.xlu1 %v1291_v55, %s1432_s12 }
 0x1d2   : > { %1302 = vrot.lane.b32.xlu0 %v1301_v57, %s1436_s25 }
 0x1d5   : > { %687 = vrot.lane.b32.xlu1 %v1151_v59, %s1434_s29  ;;  %s1160_s29 = sshll.u32 %s1495_s22, 8  ;;  %s993_s22 = scalar_lea.sflag [#allocation6], %s1579_s13 }
 0x1d6   : > { %1307 = vrot.lane.b32.xlu0 %v1291_v55, %s1437_s26 }
 0x1d9   : > { %766 = vrot.lane.b32.xlu1 %v1721_v52, %s1436_s25  ;;  %s1007_s25 = sshll.u32 %s240_s16, 4  ;;  %s1819_s25 = int_to_ptr.vmem [resolvable:$true] %s1007_s25 }
 0x1da   : > { %828 = vrot.lane.b32.xlu0 %v1154_v60, %s1439_s28  ;;  %s1362_s17 = scalar_lea.vmem %s1819_s25, 256  ;;  %p1369_p7 = scmp.lt.s32.totalorder %s1819_s25, %s1367_s9 }
 0x1db   : > { %p1363_p6 = scmp.ne.s32.totalorder %s1819_s25, %s1362_s17  ;;  %p1370_p10 = scmp.lt.s32.totalorder %s1368_s10, %s1362_s17 }
 0x1dd   : > { %797 = vrot.lane.b32.xlu1 %v1431_v3, %s1437_s26  ;;  %p1364_p12 = pnand %p1363_p6, %p1891_p11  ;;  %p1371_p2 = por %p1370_p10, %p1369_p7 }
 0x1de   : > { %1312 = vrot.lane.b32.xlu0 %v1291_v55, %s1441_s8 }
 0x1df   : > { %p1365_p13 = pneg %p1364_p12 }
 0x1e1   : > { %830 = vrot.lane.b32.xlu1 %v1440_v10, %s1439_s28  ;;  %p1372_p4 = pnand %p1371_p2, %p1365_p13 }
 0x1e2   : > { %878 = vperm.xlu0 %1285, %v875_v61  }
 0x1e5   : > { %848 = vrot.lane.b32.xlu1 %v1431_v3, %s1441_s8  ;;  %s1817_s8 = scalar_lea.hbm %s1866_s5, %s1160_s29 }
 0x23b   : > { %v1288_v4 = vpop.permute.xlu1 %1287 }
 0x23c   : > { %v1293_v5 = vpop.permute.xlu0 %1292  ;;  %v1290_v8 = vunpack.i.h.bf16 %v1288_v4  ;;  %v1289_v9 = vunpack.i.l.bf16 %v1288_v4 }
 0x23d   : > { %v1295_v20 = vunpack.i.h.bf16 %v1293_v5  ;;  %v1294_v21 = vunpack.i.l.bf16 %v1293_v5 }
 0x23e   : > { %v656_v14 = vsel %vm295_vm0, %v1289_v9, %v1290_v8 }
 0x23f   : > { %v655_v6 = vpop.permute.xlu1 %654  ;;  %v660_v22 = vsel %vm1640_vm2, %v656_v14, 0.0  ;;  %v708_v35 = vsel %vm353_vm3, %v1294_v21, %v1295_v20  ;;  %v707_v43 = vsel %vm353_vm3, %v702_v63, %v1294_v21 }
 0x240   : > { %v686_v7 = vpop.permute.xlu0 %685  ;;  %v657_v12 = vsel %vm295_vm0, %v1290_v8, %v655_v6  ;;  %vm1889_vm0 = vmpackc.low %vm1640_vm2, %vm1661_vm9 }
 0x241   : > { %v661_v10 = vsel %vm1635_vm1, %v657_v12, 0.0  ;;  %v689_v17 = vrot.slane %v686_v7, 4 }
 0x242   : > { %v1149_v24 = vpack.c.bf16 %v661_v10, %v660_v22 }
 0x243   : > { %v1298_v11 = vpop.permute.xlu1 %1297 }
 0x244   : > { %v1303_v13 = vpop.permute.xlu0 %1302  ;;  %v1300_v15 = vunpack.i.h.bf16 %v1298_v11  ;;  %v1299_v16 = vunpack.i.l.bf16 %v1298_v11 }
 0x245   : > { %v1305_v28 = vunpack.i.h.bf16 %v1303_v13  ;;  %v1304_v29 = vunpack.i.l.bf16 %v1303_v13 }
 0x246   : > { %v735_v27 = vsel %vm381_vm6, %v1299_v16, %v1300_v15  ;;  %v734_v36 = vsel %vm381_vm6, %v729_v62, %v1299_v16 }
 0x247   : > { %v688_v3 = vpop.permute.xlu1 %687  ;;  %v1186_v37 = vpack.c.bf16 %v735_v27, %v708_v35  ;;  %v773_v41 = vsel %vm420_vm10, %v1304_v29, %v1305_v28  ;;  %v1189_v46 = vpack.c.bf16 %v734_v36, %v707_v43 }
 0x248   : > { %v690_v18 = vrot.slane %v688_v3, 4  ;;  %v1308_v19 = vpop.permute.xlu0 %1307  ;;  %v1192_v50 = vpack.c.bf16 %v773_v41, %v1723_v53 }
 0x249   : > { %v1310_v38 = vunpack.i.h.bf16 %v1308_v19  ;;  %v1309_v40 = vunpack.i.l.bf16 %v1308_v19 }
 0x24a   : > { %v691_v26 = vsel %vm331_vm4, %v689_v17, %v690_v18 }
 0x24b   : > { %v767_v30 = vpop.permute.xlu1 %766  ;;  %v692_v31 = vsel %vm333_vm5, %v686_v7, %v691_v26  ;;  %v799_v54 = vsel %vm448_vm14, %v1309_v40, %v1310_v38 }
 0x24c   : > { %v829_v32 = vpop.permute.xlu0 %828  ;;  %v1121_v33 = vcombine.high %v1149_v24, %v692_v31  ;;  %v1120_v34 = vcombine.low %v1149_v24, %v692_v31  ;;  %v772_v51 = vsel %vm420_vm10, %v767_v30, %v1304_v29  ;;  %v803_v23 = vsel %vm1640_vm2, %v799_v54, 0.0 }
 0x24d   : > { %v832_v57 = vrot.slane %v829_v32, 4  ;;  %v1195_v60 = vpack.c.bf16 %v772_v51, %v1721_v52 }
 0x24e   : > { %935 = vmatprep.subr.bf16.mxu1 %v1121_v33 }
 0x24f   : > { %v798_v42 = vpop.permute.xlu1 %797  ;;  %936 = vmatpush1.bf16.msra.mxu1 %v1120_v34 }
 0x250   : > { %v800_v44 = vsel %vm448_vm14, %v1310_v38, %v798_v42  ;;  %v1313_v45 = vpop.permute.xlu0 %1312  ;;  %1187 = vmatprep.subr.msk.bf16.mxu1 %vm1167_vm8, %v1186_v37 }
 0x251   : > { %v1315_v48 = vunpack.i.h.bf16 %v1313_v45  ;;  %v1314_v49 = vunpack.i.l.bf16 %v1313_v45  ;;  %v804_v55 = vsel %vm1635_vm1, %v800_v44, 0.0  ;;  %vm1890_vm1 = vcmask 916480  }
 0x252   : > { %v1156_v61 = vpack.c.bf16 %v804_v55, %v803_v23 }
 0x253   : > { %v831_v56 = vpop.permute.xlu1 %830  ;;  %1190 = vmatpush1.bf16.msk.msra.mxu1 %vm1889_vm0, %v1189_v46  ;;  %v850_v53 = vsel %vm501_vm11, %v1314_v49, %v1315_v48 }
 0x254   : > { %v833_v59 = vrot.slane %v831_v56, 4  ;;  %1193 = vmatprep.subr.msk.bf16.mxu1 %vm1680_vm13, %v1192_v50  ;;  %v854_v58 = vsel %vm1661_vm9, %v850_v53, 0.0 }
 0x255   : > { %v1183_v8 = vpack.c.bf16 %v854_v58, %v854_v58 }
 0x256   : > { %v834_v62 = vsel %vm331_vm4, %v832_v57, %v833_v59 }
 0x257   : > { %v849_v63 = vpop.permute.xlu1 %848  ;;  %1196 = vmatpush1.bf16.msk.msra.mxu1 %vm1692_vm15, %v1195_v60  ;;  %v835_v4 = vsel %vm1890_vm1, %v829_v32, %v834_v62  ;;  %v930_v2 = vsel %vm331_vm4, %v1183_v8, 0 }
 0x258   : > { %v851_v5 = vsel %vm501_vm11, %v1315_v48, %v849_v63  ;;  %v1127_v6 = vcombine.high %v1156_v61, %v835_v4  ;;  %v1126_v7 = vcombine.low %v1156_v61, %v835_v4 }
 0x259   : > { %v855_v25 = vsel %vm1650_vm7, %v851_v5, 0.0 }
 0x25a   : > { %v1184_v52 = vpack.c.bf16 %v855_v25, %v855_v25  ;;  %941 = vmatprep.subr.bf16.mxu1 %v1127_v6 }
 0x25b   : > { %942 = vmatpush1.bf16.msra.mxu1 %v1126_v7 }
 0x25c   : > { %1130 = vmatprep.subr.msk.bf16.mxu1 %vm331_vm4, %v1184_v52 }
 0x25f   : > { %944 = vmatpush1.bf16.msra.mxu1 %v930_v2 }
 0x261   : > { %v879_v9 = vpop.permute.xlu0 %878 }
 0x262   : > { %1131 = vmatmul.mubr.msk.bf16.vlgmr.msra.gmra.mrb[0].mxu1 %vm578_vm12, %v874_v47 }
 0x335   : > { %v969_v11 = vpop.f32.mrb[0].mxu1 }
 0x336   : > { %v970_v12 = vadd.f32 %v969_v11, %v879_v9  ;;  %v971_v39 = vpop.f32.mrb[1].mxu1 }
 0x337   : > { %v972_v13 = vadd.f32 %v971_v39, %v879_v9  ;;  %v973_v14 = vpop.f32.mrb[2].mxu1 }
 0x338   : > { %v976_v10 = vsub.f32 0.0, %v970_v12  ;;  %v974_v15 = vpop.f32.mrb[3].mxu1 }
 0x339   : > { %v977_v16 = vsub.f32 0.0, %v972_v13 }
 0x33a   : > { %v978_v3 = vmul.f32 1.442695, %v976_v10 }
 0x33b   : > { %v980_v17 = vmul.f32 1.442695, %v977_v16 }
 0x33c   : > { %1324 = vpow2.f32 %v978_v3 }
 0x33d   : > { %1326 = vpow2.f32 %v980_v17 }
 0x346   : > { %v1325_v18 = vpop.eup %1324 }
 0x347   : > { %v1327_v19 = vpop.eup %1326  ;;  %v982_v20 = vadd.f32 1.0, %v1325_v18 }
 0x348   : > { %v983_v21 = vadd.f32 1.0, %v1327_v19 }
 0x349   : > { %1328 = vrcp.f32 %v982_v20 }
 0x34a   : > { %1330 = vrcp.f32 %v983_v21 }
 0x353   : > { %v1329_v22 = vpop.eup %1328 }
 0x354   : > { %v1331_v24 = vpop.eup %1330  ;;  %v986_v26 = vmul.f32 %v1329_v22, %v970_v12 }
 0x355   : > { %v987_v27 = vmul.f32 %v1331_v24, %v972_v13 }
 0x356   : > { %v988_v28 = vadd.f32 %v986_v26, %v1589_v0 }
 0x357   : > { %v989_v29 = vadd.f32 %v987_v27, %v1591_v1 }
 0x358   : > { %990 = vst [vmem:[%s240_s16] sm:$0xff] %v988_v28 }
 0x359   : > { %991 = vst [vmem:[%s240_s16 + $0x8] sm:$0xff] %v989_v29 }
 0x35a   : > { %1375 = shalt.err (!%p1372_p4)
}
 0x35b   : > { %s1376_s13 = scalar_lea.hbm %s1817_s8, 256  ;;  %s1380_s15 = scalar_lea.hbm %s1866_s5, 512 }
 0x35c   : > { %p1377_p5 = scmp.ne.s32.totalorder %s1817_s8, %s1376_s13  ;;  %p1381_p0 = scmp.lt.u32.totalorder %s1817_s8, %s1866_s5 }
 0x35d   : > { %p1382_p1 = scmp.lt.u32.totalorder %s1380_s15, %s1376_s13  ;;  %p1384_p6 = scmp.lt.u32.totalorder %s1376_s13, %s1817_s8 }
 0x35e   : > { %p1378_p8 = pnand %p1377_p5, %p1891_p11 }
 0x35f   : > { %p1383_p3 = por %p1382_p1, %p1381_p0 }
 0x360   : > { %p1379_p9 = pneg %p1378_p8 }
 0x361   : > { %p1385_p12 = por %p1384_p6, %p1383_p3 }
 0x363   : > { %p1386_p13 = pnand %p1385_p12, %p1379_p9 }
 0x365   : > { %1389 = shalt.err (!%p1386_p13)
}
 0x366   : > { %1199 = dma.vmem_to_hbm [thread:$0]  (%p1891_p11), %s1819_s25, 256, %s1817_s8, %s993_s22  }
 0x367 PF: > { %s1019_s29 = sand.u32 1, %s1416_s18   ;;  %p1892_p7 = scmp.ne.s32.totalorder %s1873_s6, 0 }
 0x368   : > { %p1893_p10 = scmp.ge.s32.totalorder %s1428_s21, 2  ;;  %s1020_s16 = scalar_lea.sflag [#allocation6], %s1019_s29 }
 0x36a   : > { %p1206_p2 = pnand %p1893_p10, %p1892_p7 }
 0x36c   : > { %1411 = dma.done.wait (!%p1206_p2), %s1020_s16, 256  }
 0x36d   : > { %1413 = vsyncadd (!%p1206_p2), %s1020_s16, 4294967040  ;;  %p18_p4 = scmp.ge.s32.totalorder %s1499_s24, 4   ;;  %s1894_s18 = smov %s1420_s19 }
 0x36e   : > { %s1895_s19 = smov %s1424_s20  ;;  %s1896_s20 = smov %s1511_s27 }
 0x36f   : > { %s1897_s21 = smov %s1499_s24  ;;  %20 = sbr.rel (!%p18_p4) target bundleno = 5 (0x5), region = 85 }
 0x376   :  { %1025 = vsyncpa [#allocation5], 1 }
 0x377   :  { %1027 = vsyncpa [#allocation5 + $0x1], 1 }
 0x378   :  { %1028 = vsyncpa [#allocation6], 1 }
 0x379   :  { %1030 = vsyncpa [#allocation6 + $0x1], 1 }

</bundles_post_ra>
